<compile_context>
chip_gen: v7x
topology: tpu7x:2x2x1
jax: 0.10.0
libtpu: 0.0.40
codegen_flags: <defaults>
</compile_context>

<pallas_src>
import jax
import jax.numpy as jnp
from jax.experimental import pallas as pl
from jax.experimental.pallas import tpu as pltpu

PAD_IDX = 0  # word2idx['<PAD>'] == 0 in the reference vocab construction


def _round_up(x, m):
    return ((x + m - 1) // m) * m


def _cdiv(a, b):
    return (a + b - 1) // b


def mean_embedder_kernel(tok_ref, g_ref, b_ref, out_ref):
    """One batch tile.

    tok_ref : (S, TB) int32 — token ids, batch rows on the lane axis
    g_ref   : (S, TB) f32   — gathered per-token scores (embedding @ fc_w)[token]
    b_ref   : (1,)    f32   — fc bias, SMEM
    out_ref : (1, TB) f32   — sigmoid output, lane-dense
    """
    valid = tok_ref[...] != PAD_IDX                                  # (S, TB) bool
    g = jnp.where(valid, g_ref[...], 0.0)                            # (S, TB) f32
    # Whole-tile sublane reductions (XLU) instead of a serial loop over S.
    acc = jnp.sum(g, axis=0, keepdims=True)                          # (1, TB)
    cnt = jnp.sum(valid.astype(jnp.float32), axis=0, keepdims=True)  # (1, TB)
    mean = acc / (cnt + 1e-8)                                        # (1, TB)
    # Dropout(0.5) -> identity in eval mode.
    # TODO(synk): training-mode dropout (stateful PRNG mask) not implemented.
    out_ref[...] = jax.nn.sigmoid(mean + b_ref[0])                   # (1, TB)


def mean_embedder(tokens, lengths, embedding, fc_w, fc_b, *, batch_tile=512):
    """Forward pass matching MeanEmbedder.forward(x, lengths).

    `lengths` is accepted for signature parity but (as in the PyTorch module)
    is unused: the mask is derived from the token values themselves.
    """
    del lengths
    B, S = tokens.shape
    V, D = embedding.shape

    # Fold the Linear head into the table (sanctioned rewrite):
    #   sigmoid(mean_s(E[t_s]) @ w + b) == sigmoid(mean_s(E[t_s] @ w) + b)
    scores = jnp.dot(embedding.astype(jnp.float32),
                     fc_w.astype(jnp.float32).reshape(D))            # (V,)

    # Batch tiling: rows on the lane axis; always pad to a multiple of 128 so every
    # tile / store is lane-dense and unmasked.  Keep >= 2 grid steps when possible
    # so v7x's two TensorCores both get a share of the "parallel" batch axis.
    B128 = _round_up(max(B, 1), 128)
    n_tiles = max(1, _cdiv(B128, batch_tile))
    if n_tiles == 1 and B128 >= 256:
        n_tiles = 2
    TB = _round_up(_cdiv(B128, n_tiles), 128)
    B_pad = n_tiles * TB

    tok = jnp.pad(tokens.astype(jnp.int32), ((0, B_pad - B), (0, 0)),
                  constant_values=PAD_IDX)                           # (B_pad, S)
    gathered = scores[tok]                                           # (B_pad, S) XLA gather
    tok_t = tok.T                                                    # (S, B_pad)
    g_t = gathered.T                                                 # (S, B_pad)

    bias = jnp.asarray(fc_b, jnp.float32).reshape(1)                 # (1,) SMEM scalar

    grid = (n_tiles,)
    out = pl.pallas_call(
        mean_embedder_kernel,
        out_shape=jax.ShapeDtypeStruct((1, B_pad), jnp.float32),
        grid=grid,
        in_specs=[
            pl.BlockSpec((S, TB), lambda i: (0, i)),                           # token tile
            pl.BlockSpec((S, TB), lambda i: (0, i)),                           # gathered scores tile
            pl.BlockSpec(memory_space=pltpu.MemorySpace.SMEM),                 # bias scalar (1,)
        ],
        out_specs=pl.BlockSpec((1, TB), lambda i: (0, i)),                     # lane-dense out
        compiler_params=pltpu.CompilerParams(dimension_semantics=("parallel",)),
    )(tok_t, g_t, bias)

    return out[0, :B]                                                # (B,) — .squeeze(1)


def _reference(tokens, embedding, fc_w, fc_b):
    mask = (tokens != PAD_IDX).astype(jnp.float32)[:, :, None]
    x = embedding[tokens] * mask
    summed = x.sum(axis=1)
    length = mask.sum(axis=1)
    mean = summed / (length + 1e-8)
    return jax.nn.sigmoid(mean @ fc_w + fc_b)[:, 0]


def _make_inputs(key, B, S, V, D, min_len=1):
    k_emb, k_w, k_b, k_tok, k_len = jax.random.split(key, 5)
    # nn.Embedding(V, D, padding_idx=0): normal init, padding row zeroed.
    embedding = jax.random.normal(k_emb, (V, D), dtype=jnp.float32)
    embedding = embedding.at[PAD_IDX].set(0.0)
    # nn.Linear(D, 1): uniform(-1/sqrt(D), 1/sqrt(D)) init for weight & bias.
    bound = 1.0 / (D ** 0.5)
    fc_w = jax.random.uniform(k_w, (D, 1), jnp.float32, -bound, bound)
    fc_b = jax.random.uniform(k_b, (1, 1), jnp.float32, -bound, bound)
    # Token ids in [1, V); pad tail of each sequence to PAD per `lengths`.
    lengths = jax.random.randint(k_len, (B,), min_len, S + 1, dtype=jnp.int32)
    tokens = jax.random.randint(k_tok, (B, S), 1, V, dtype=jnp.int32)
    pos = jnp.arange(S)[None, :]
    tokens = jnp.where(pos < lengths[:, None], tokens, PAD_IDX)
    return tokens, lengths, embedding, fc_w, fc_b


if __name__ == "__main__":
    key = jax.random.PRNGKey(0)
    k1, k2 = jax.random.split(key)

    # Small canonical test (matches the module's toy sizes).
    B, S, V, D = 2, 8, 64, 32
    tokens, lengths, embedding, fc_w, fc_b = _make_inputs(k1, B, S, V, D)
    out = mean_embedder(tokens, lengths, embedding, fc_w, fc_b)
    out = jax.block_until_ready(out)
    ref = _reference(tokens, embedding, fc_w, fc_b)
    assert out.shape == (B,)
    assert jnp.allclose(out, ref, atol=1e-5, rtol=1e-5), (out, ref)

    # Larger test: realistic vocab (MAX_VOCAB_SIZE), batch padding, 2-step grid.
    B2, S2, V2, D2 = 130, 16, 5000, 32
    tokens2, lengths2, embedding2, fc_w2, fc_b2 = _make_inputs(k2, B2, S2, V2, D2)
    out2 = mean_embedder(tokens2, lengths2, embedding2, fc_w2, fc_b2)
    out2 = jax.block_until_ready(out2)
    ref2 = _reference(tokens2, embedding2, fc_w2, fc_b2)
    assert out2.shape == (B2,)
    assert jnp.allclose(out2, ref2, atol=1e-5, rtol=1e-5)

    print("KERNEL_OK")
</pallas_src>

<mosaic_0001>
module attributes {stable_mosaic.version = 11 : i64} {
  func.func @mean_embedder_kernel(%arg0: i32, %arg1: memref<8x128xi32, #tpu.memory_space<vmem>>, %arg2: memref<8x128xf32, #tpu.memory_space<vmem>>, %arg3: memref<1xf32, #tpu.memory_space<smem>>, %arg4: memref<1x128xf32, #tpu.memory_space<vmem>>) attributes {dimension_semantics = [#tpu.dimension_semantics<parallel>], iteration_bounds = array<i64: 1>, scalar_prefetch = 0 : i64, scratch_operands = 0 : i64, tpu.core_type = #tpu.core_type<tc>, window_params = [{transform_indices = @transform_0, window_bounds = array<i64: 8, 128>}, {transform_indices = @transform_1, window_bounds = array<i64: 8, 128>}, {transform_indices = @transform_2, window_bounds = array<i64: 1>}, {transform_indices = @transform_3, window_bounds = array<i64: 1, 128>}]} {
    %c0 = arith.constant 0 : index
    %c0_0 = arith.constant 0 : index
    %0 = vector.load %arg1[%c0, %c0_0] : memref<8x128xi32, #tpu.memory_space<vmem>>, vector<8x128xi32>
    %c0_i32 = arith.constant 0 : i32
    %1 = vector.broadcast %c0_i32 : i32 to vector<8x128xi32>
    %2 = arith.cmpi ne, %0, %1 : vector<8x128xi32>
    %c0_1 = arith.constant 0 : index
    %c0_2 = arith.constant 0 : index
    %3 = vector.load %arg2[%c0_1, %c0_2] : memref<8x128xf32, #tpu.memory_space<vmem>>, vector<8x128xf32>
    %cst = arith.constant 0.000000e+00 : f32
    %4 = vector.broadcast %cst : f32 to vector<8x128xf32>
    %5 = arith.select %2, %3, %4 : vector<8x128xi1>, vector<8x128xf32>
    %cst_3 = arith.constant dense<0.000000e+00> : vector<128xf32>
    %6 = vector.multi_reduction <add>, %5, %cst_3 [0] : vector<8x128xf32> to vector<128xf32>
    %7 = vector.shape_cast %6 : vector<128xf32> to vector<1x128xf32>
    %8 = arith.extui %2 : vector<8x128xi1> to vector<8x128xi32>
    %9 = arith.sitofp %8 : vector<8x128xi32> to vector<8x128xf32>
    %cst_4 = arith.constant dense<0.000000e+00> : vector<128xf32>
    %10 = vector.multi_reduction <add>, %9, %cst_4 [0] : vector<8x128xf32> to vector<128xf32>
    %11 = vector.shape_cast %10 : vector<128xf32> to vector<1x128xf32>
    %cst_5 = arith.constant 9.99999993E-9 : f32
    %12 = vector.broadcast %cst_5 : f32 to vector<1x128xf32>
    %13 = arith.addf %11, %12 : vector<1x128xf32>
    %14 = arith.divf %7, %13 : vector<1x128xf32>
    %c0_6 = arith.constant 0 : index
    %15 = memref.load %arg3[%c0_6] : memref<1xf32, #tpu.memory_space<smem>>
    %16 = vector.broadcast %15 : f32 to vector<1x128xf32>
    %17 = arith.addf %14, %16 : vector<1x128xf32>
    %18 = arith.negf %17 : vector<1x128xf32>
    %19 = math.exp %18 : vector<1x128xf32>
    %cst_7 = arith.constant 1.000000e+00 : f32
    %20 = vector.broadcast %cst_7 : f32 to vector<1x128xf32>
    %21 = arith.addf %20, %19 : vector<1x128xf32>
    %22 = arith.divf %20, %21 : vector<1x128xf32>
    %c0_8 = arith.constant 0 : index
    %c0_9 = arith.constant 0 : index
    %23 = vector.load %arg4[%c0_8, %c0_9] : memref<1x128xf32, #tpu.memory_space<vmem>>, vector<1x128xf32>
    tpu.vector_store %arg4[%c0_8, %c0_9], %22 {strides = array<i32>} : memref<1x128xf32, #tpu.memory_space<vmem>>, vector<1x128xf32>,
    return
  }
  func.func @transform_0(%arg0: i32) -> (i32, i32) {
    %c0_i32 = arith.constant 0 : i32
    %c0_i32_0 = arith.constant 0 : i32
    return %c0_i32, %arg0 : i32, i32
  }
  func.func @transform_1(%arg0: i32) -> (i32, i32) {
    %c0_i32 = arith.constant 0 : i32
    %c0_i32_0 = arith.constant 0 : i32
    return %c0_i32, %arg0 : i32, i32
  }
  func.func @transform_2(%arg0: i32) -> i32 {
    %c0_i32 = arith.constant 0 : i32
    %c0_i32_0 = arith.constant 0 : i32
    return %c0_i32 : i32
  }
  func.func @transform_3(%arg0: i32) -> (i32, i32) {
    %c0_i32 = arith.constant 0 : i32
    %c0_i32_0 = arith.constant 0 : i32
    return %c0_i32, %arg0 : i32, i32
  }
}

</mosaic_0001>

<bundles_post_ra>
// kernel: tpu_custom_call.1
= control target key start
LH: loop header
LB: loop body
LE: loop exit
PB: predicated region body
PF: predicated region fallthrough
CT: control target
= control target key end

     0   :  { %9 = vsyncpa [#allocation4], 0  ;;  %s234_s0 = inlined_call_operand.hbm [shape: s32[8,128], index: 0, kind: input, shape index: {}]   ;;  %s235_s1 = inlined_call_operand.hbm [shape: f32[8,128], index: 1, kind: input, shape index: {}]   ;;  %s236_s2 = inlined_call_operand.<no memory space> [shape: f32[1], index: 2, kind: input, shape index: {}]   ;;  %s237_s3 = inlined_call_operand.hbm [shape: f32[1,128], index: 3, kind: output, shape index: {}]  }
   0x1   :  { %10 = vsyncpa [#allocation7], 0 }
   0x2   :  { %11 = vsyncpa [#allocation5], 0  ;;  %s171_s12 = smov [#allocation3]   ;;  %s172_s14 = smov [#allocation6]  }
   0x3   :  { %s18_s13 = sshll.u32 %s171_s12, 4  ;;  %s28_s15 = sshll.u32 %s172_s14, 4  ;;  %s19_s13 = int_to_ptr.vmem [resolvable:$true] %s18_s13  ;;  %s29_s15 = int_to_ptr.vmem [resolvable:$true] %s28_s15 }
   0x4   :  { %s99_s18 = scalar_lea.hbm %s234_s0, 128 }
   0x5   :  { %p100_p0 = scmp.ne.s32.totalorder %s234_s0, %s99_s18  ;;  %p103_p1 = scmp.lt.u32.totalorder %s99_s18, %s234_s0 }
   0x7   :  { %p105_p2 = pnand %p103_p1, %p100_p0 }
   0x9   :  { %108 = shalt.err (!%p105_p2)
}
   0xa   :  { %s109_s23 = scalar_lea.vmem %s19_s13, 128  ;;  %p114_p4 = scmp.lt.s32.totalorder %s19_s13, %s19_s13 }
   0xb   :  { %p110_p3 = scmp.ne.s32.totalorder %s19_s13, %s109_s23  ;;  %p115_p5 = scmp.lt.s32.totalorder %s109_s23, %s109_s23 }
   0xd   :  { %p116_p6 = por %p115_p5, %p114_p4 }
   0xf   :  { %p117_p7 = pnand %p116_p6, %p110_p3 }
  0x11   :  { %120 = shalt.err (!%p117_p7)
}
  0x12   :  { %21 = dma.hbm_to_vmem [thread:$0]  %s234_s0, 128, %s19_s13, [#allocation4]  }
  0x13   :  { %s121_s28 = scalar_lea.hbm %s235_s1, 128 }
  0x14   :  { %p122_p8 = scmp.ne.s32.totalorder %s235_s1, %s121_s28  ;;  %p125_p9 = scmp.lt.u32.totalorder %s121_s28, %s235_s1 }
  0x16   :  { %p127_p10 = pnand %p125_p9, %p122_p8 }
  0x18   :  { %130 = shalt.err (!%p127_p10)
}
  0x19   :  { %s131_s6 = scalar_lea.vmem %s29_s15, 128  ;;  %p136_p12 = scmp.lt.s32.totalorder %s29_s15, %s29_s15 }
  0x1a   :  { %p132_p11 = scmp.ne.s32.totalorder %s29_s15, %s131_s6  ;;  %p137_p13 = scmp.lt.s32.totalorder %s131_s6, %s131_s6 }
  0x1c   :  { %p138_p0 = por %p137_p13, %p136_p12 }
  0x1e   :  { %p139_p1 = pnand %p138_p0, %p132_p11 }
  0x20   :  { %142 = shalt.err (!%p139_p1)
}
  0x21   :  { %31 = dma.hbm_to_vmem [thread:$0]  %s235_s1, 128, %s29_s15, [#allocation7]  }
  0x22   :  { %165 = dma.done.wait [#allocation4], 128  }
  0x23   :  { %166 = vsyncadd [#allocation4], 4294967168 }
  0x24   :  { %167 = dma.done.wait [#allocation7], 128  }
  0x25   :  { %168 = vsyncadd [#allocation7], 4294967168  ;;  %v40_v0 = vld [vmem:[#allocation3] sm:$0xff]  ;;  %v42_v1 = vld [vmem:[#allocation6] sm:$0xff]  ;;  %v173_v3 = vmov 0.0   ;;  %v62_v19 = vstv %s236_s2  ;;  %s174_s9 = smov [#allocation8]  }
  0x26   :  { %vm41_vm0 = vcmp.ne.s32.totalorder %v40_v0, 0  ;;  %s77_s10 = sshll.u32 %s174_s9, 4  ;;  %s78_s10 = int_to_ptr.vmem [resolvable:$true] %s77_s10 }
  0x27   :  { %v43_v2 = vsel %vm41_vm0, %v42_v1, 0.0  ;;  %v87_v4 = vsel %vm41_vm0, 1.0, %v173_v3  ;;  %s143_s11 = scalar_lea.vmem %s78_s10, 16  ;;  %s147_s12 = scalar_lea.vmem %s78_s10, 32 }
  0x28   :  { %v52_v5 = vrot.slane %v87_v4, 4  ;;  %v44_v6 = vrot.slane %v43_v2, 4  ;;  %p144_p2 = scmp.ne.s32.totalorder %s78_s10, %s143_s11  ;;  %p148_p3 = scmp.lt.s32.totalorder %s78_s10, %s78_s10 }
  0x29   :  { %p149_p4 = scmp.lt.s32.totalorder %s147_s12, %s143_s11 }
  0x2a   :  { %v53_v7 = vadd.f32 %v87_v4, %v52_v5  ;;  %v45_v9 = vadd.f32 %v44_v6, %v43_v2 }
  0x2b   :  { %p150_p5 = por %p149_p4, %p148_p3 }
  0x2c   :  { %v54_v8 = vrot.slane %v53_v7, 2  ;;  %v46_v12 = vrot.slane %v45_v9, 2 }
  0x2d   :  { %p151_p6 = pnand %p150_p5, %p144_p2 }
  0x2e   :  { %v55_v10 = vadd.f32 %v54_v8, %v53_v7  ;;  %v47_v15 = vadd.f32 %v46_v12, %v45_v9 }
  0x30   :  { %v56_v11 = vrot.slane %v55_v10, 1  ;;  %v48_v16 = vrot.slane %v47_v15, 1 }
  0x32   :  { %v57_v13 = vadd.f32 %v56_v11, %v55_v10  ;;  %v49_v17 = vadd.f32 %v48_v16, %v47_v15 }
  0x34   :  { %v58_v14 = vadd.f32 1e-08, %v57_v13 }
  0x36   :  { %93 = vrcp.f32 %v58_v14 }
  0x40   :  { %v94_v18 = vpop.eup %93 }
  0x41   :  { %v60_v20 = vmul.f32 %v94_v18, %v49_v17 }
  0x43   :  { %v63_v21 = vadd.f32 %v62_v19, %v60_v20 }
  0x45   :  { %v88_v22 = vmul.f32 -1.442695, %v63_v21 }
  0x47   :  { %95 = vpow2.f32 %v88_v22 }
  0x51   :  { %v96_v23 = vpop.eup %95 }
  0x52   :  { %v67_v24 = vadd.f32 1.0, %v96_v23 }
  0x54   :  { %97 = vrcp.f32 %v67_v24 }
  0x5e   :  { %v98_v25 = vpop.eup %97 }
  0x5f   :  { %70 = vst [vmem:[#allocation8] sm:$0x1] %v98_v25 }
  0x60   :  { %154 = shalt.err (!%p151_p6)
}
  0x61   :  { %s155_s14 = scalar_lea.hbm %s237_s3, 16 }
  0x62   :  { %p156_p7 = scmp.ne.s32.totalorder %s237_s3, %s155_s14  ;;  %p159_p8 = scmp.lt.u32.totalorder %s155_s14, %s237_s3 }
  0x64   :  { %p161_p9 = pnand %p159_p8, %p156_p7 }
  0x66   :  { %164 = shalt.err (!%p161_p9)
}
  0x67   :  { %80 = dma.vmem_to_hbm [thread:$0]  %s78_s10, 16, %s237_s3, [#allocation5]  }
  0x68   :  { %169 = dma.done.wait [#allocation5], 16  }
  0x69   :  { %170 = vsyncadd [#allocation5], 4294967280 }
  0x6a   :  { %84 = vsyncpa [#allocation4], 1 }
  0x6b   :  { %85 = vsyncpa [#allocation7], 1 }
  0x6c   :  { %86 = vsyncpa [#allocation5], 1 }

</bundles_post_ra>
